<compile_context>
chip_gen: v5e
topology: v5e:2x2
jax: 0.10.0
libtpu: 0.0.40
codegen_flags: <defaults>
</compile_context>

<pallas_src>
import functools

import jax
import jax.numpy as jnp
import numpy as np
from jax.experimental import pallas as pl
from jax.experimental.pallas import tpu as pltpu


# ---------------------------------------------------------------------------
# Pallas kernel: the whole DBB forward is one bias-added matmul
# ---------------------------------------------------------------------------
def _dbb_fused_kernel(a_ref, w_ref, b_ref, o_ref):
    """y = W @ A + b  — single MXU contraction covering all four DBB branches.

      a_ref: (Kp, Lt)   bf16  im2col patches (rows: (tap_i,tap_j,channel),
                              lanes: flattened (batch, H, W) chunk)
      w_ref: (Cout, Kp) bf16  merged, BN-folded DBB weight
      b_ref: (Cout, 1)  f32   merged bias (all 4 branches + border-fill terms)
      o_ref: (Cout, Lt) f32
    """
    o_ref[...] = (
        jnp.dot(w_ref[...], a_ref[...], preferred_element_type=jnp.float32)
        + b_ref[...]
    )


# ---------------------------------------------------------------------------
# Parameter folding (exact, f32, done ONCE outside the per-call jit path)
# ---------------------------------------------------------------------------
def _bn_scale_shift(bn):
    gamma, beta, mean, var, eps = bn
    s = gamma / jnp.sqrt(var + eps)
    return s, beta - mean * s


def fold_dbb_params(params, k):
    """Fold the four DBB branches (eval-mode BN, groups=1, stride=1) into one
    kxk conv weight + bias, exactly (real arithmetic), mirroring the module's
    get_equivalent_kernel_bias.  Key identity used: a 1x1 conv of the
    zero-padded input is 0 on the pad ring, so BNAndPadLayer's border fill
    equals the BN shift everywhere and folds into a pure bias correction."""
    origin_w = params['origin_w']
    cout, cin = origin_w.shape[0], origin_w.shape[1]

    s_o, b_o = _bn_scale_shift(params['origin_bn'])
    s_1, b_1 = _bn_scale_shift(params['k1x1_bn'])
    s_a1, b_a1 = _bn_scale_shift(params['avg_bnpad'])
    s_a2, b_a2 = _bn_scale_shift(params['avg_bn'])
    s_k1, b_k1 = _bn_scale_shift(params['kxk_bn1'])
    s_k2, b_k2 = _bn_scale_shift(params['kxk_bn2'])

    # branch 1: origin kxk conv + BN
    k_origin = origin_w * s_o[:, None, None, None]
    bias = b_o

    # branch 2: 1x1 conv + BN  -> centered kxk kernel (transVI)
    c = k // 2
    k_1x1 = jnp.zeros((cout, cin, k, k), jnp.float32)
    k_1x1 = k_1x1.at[:, :, c, c].set(params['k1x1_w'][:, :, 0, 0] * s_1[:, None])
    bias = bias + b_1

    # branch 3: 1x1 conv -> BN+pad -> AvgPool(k) -> BN   (transV / transIII)
    w_avg = params['avg_conv_w'][:, :, 0, 0]                         # (cout, cin)
    k_avg = jnp.broadcast_to(
        (w_avg * (s_a1 * s_a2 / float(k * k))[:, None])[:, :, None, None],
        (cout, cin, k, k))
    bias = bias + s_a2 * b_a1 + b_a2

    # branch 4: IdentityBasedConv1x1 -> BN+pad -> kxk conv -> BN  (transIII)
    idk = params['idconv_w'][:, :, 0, 0] + jnp.eye(cin, dtype=jnp.float32)
    k2w = params['kxk_conv2_w']                                      # (cout, cin, k, k)
    k_kxk = jnp.einsum('ocij,c,cd->odij', k2w, s_k1, idk) * s_k2[:, None, None, None]
    bias = bias + s_k2 * jnp.einsum('ocij,c->o', k2w, b_k1) + b_k2

    w_eq = k_origin + k_1x1 + k_avg + k_kxk                          # (cout,cin,k,k)

    # tap-matrix row order (tap_i, tap_j, channel), matching the patch builder
    w_mat = jnp.transpose(w_eq, (0, 2, 3, 1)).reshape(cout, k * k * cin)
    kdim = k * k * cin
    kdim_p = ((kdim + 15) // 16) * 16                                # bf16 sublane pack
    if kdim_p != kdim:
        w_mat = jnp.concatenate(
            [w_mat, jnp.zeros((cout, kdim_p - kdim), jnp.float32)], axis=1)

    return {'w_mat': w_mat.astype(jnp.bfloat16),
            'bias': bias[:, None].astype(jnp.float32)}


# ---------------------------------------------------------------------------
# Forward
# ---------------------------------------------------------------------------
def _pick_lane_tile(L):
    """Single full-width step when small (v5e/v6e: one TC, per-step overhead
    dominates); 512+-lane parallel chunks otherwise (v7x megacore/pipelining).
    TODO(synk): derive the production tile from v7x's 64 MiB VMEM."""
    if L <= 1024:
        return L
    for t in (2048, 1024, 512):
        if L % t == 0:
            return t
    return L


def dbb_forward(x_nchw, folded, k, padding):
    """DBB forward (non-deploy, eval-mode BN, nonlinear=Identity), NCHW in/out."""
    n, cin, h, w = x_nchw.shape
    p = padding
    hw = h * w
    L = n * hw
    cout, kdim_p = folded['w_mat'].shape
    kdim = k * k * cin

    # --- tiny XLA glue: bf16 cast, zero pad, im2col with lane dim = n*H*W ---
    x_b = jnp.transpose(x_nchw, (1, 0, 2, 3)).astype(jnp.bfloat16)   # (cin, n, h, w)
    x_pad = jnp.pad(x_b, ((0, 0), (0, 0), (p, p), (p, p)))
    taps = [x_pad[:, :, i:i + h, j:j + w].reshape(cin, L)
            for i in range(k) for j in range(k)]
    if kdim_p != kdim:
        taps.append(jnp.zeros((kdim_p - kdim, L), jnp.bfloat16))
    a_mat = jnp.concatenate(taps, axis=0)                            # (kdim_p, L)

    lane_tile = _pick_lane_tile(L)
    grid = (L // lane_tile,)

    y = pl.pallas_call(
        _dbb_fused_kernel,
        out_shape=jax.ShapeDtypeStruct((cout, L), jnp.float32),
        grid=grid,
        in_specs=[
            pl.BlockSpec((kdim_p, lane_tile), lambda i: (0, i)),
            pl.BlockSpec((cout, kdim_p), lambda i: (0, 0)),
            pl.BlockSpec((cout, 1), lambda i: (0, 0)),
        ],
        out_specs=pl.BlockSpec((cout, lane_tile), lambda i: (0, i)),
        compiler_params=pltpu.CompilerParams(dimension_semantics=("parallel",)),
    )(a_mat, folded['w_mat'], folded['bias'])

    return jnp.transpose(y.reshape(cout, n, h, w), (1, 0, 2, 3))     # NCHW out


# ---------------------------------------------------------------------------
# Deterministic parameter initialization (shapes from DBB.__init__)
# in=4, out=8, k=3, groups=1 -> internal_channels_1x1_3x3 = in_channels (idconv1)
# ---------------------------------------------------------------------------
def init_dbb_params(key, cin, cout, k):
    keys = jax.random.split(key, 11)

    def conv_w(kk_, shape, s=0.2):
        return s * jax.random.normal(kk_, shape, jnp.float32)

    def bn_p(kk_, c):
        k1, k2, k3, k4 = jax.random.split(kk_, 4)
        gamma = 1.0 + 0.1 * jax.random.normal(k1, (c,), jnp.float32)
        beta = 0.1 * jax.random.normal(k2, (c,), jnp.float32)
        mean = 0.1 * jax.random.normal(k3, (c,), jnp.float32)
        var = 0.5 + jax.random.uniform(k4, (c,), jnp.float32)
        return (gamma, beta, mean, var, 1e-5)

    return {
        'origin_w': conv_w(keys[0], (cout, cin, k, k)),       # OIHW
        'origin_bn': bn_p(keys[1], cout),
        'k1x1_w': conv_w(keys[2], (cout, cin, 1, 1)),
        'k1x1_bn': bn_p(keys[3], cout),
        'avg_conv_w': conv_w(keys[4], (cout, cin, 1, 1)),
        'avg_bnpad': bn_p(keys[5], cout),
        'avg_bn': bn_p(keys[6], cout),
        'idconv_w': conv_w(keys[7], (cin, cin, 1, 1), s=0.05),
        'kxk_bn1': bn_p(keys[8], cin),
        'kxk_conv2_w': conv_w(keys[9], (cout, cin, k, k)),
        'kxk_bn2': bn_p(keys[10], cout),
    }


# ---------------------------------------------------------------------------
# Pure-JAX reference (mirrors the PyTorch four-branch forward, eval-mode BN)
# ---------------------------------------------------------------------------
def _conv_ref(x, w_oihw, pad=0):
    return jax.lax.conv_general_dilated(
        x, w_oihw, (1, 1), [(pad, pad), (pad, pad)],
        dimension_numbers=('NCHW', 'OIHW', 'NCHW'),
        precision=jax.lax.Precision.HIGHEST)


def _bn_ref(x, bn):
    gamma, beta, mean, var, eps = bn
    s = gamma / jnp.sqrt(var + eps)
    b = beta - mean * s
    return x * s.reshape(1, -1, 1, 1) + b.reshape(1, -1, 1, 1)


def _bn_pad_ref(x, bn, p):
    gamma, beta, mean, var, eps = bn
    s = gamma / jnp.sqrt(var + eps)
    b = beta - mean * s
    out = x * s.reshape(1, -1, 1, 1) + b.reshape(1, -1, 1, 1)
    if p > 0:
        pv = b.reshape(1, -1, 1, 1)
        out = jnp.pad(out, ((0, 0), (0, 0), (p, p), (p, p)))
        out = out.at[:, :, :p, :].set(pv)
        out = out.at[:, :, -p:, :].set(pv)
        out = out.at[:, :, :, :p].set(pv)
        out = out.at[:, :, :, -p:].set(pv)
    return out


def _avgpool_ref(x, k):
    s = jax.lax.reduce_window(x, 0.0, jax.lax.add, (1, 1, k, k), (1, 1, 1, 1), 'VALID')
    return s / float(k * k)


def dbb_forward_ref(x, params, k, padding):
    x = x.astype(jnp.float32)
    cin = x.shape[1]
    # branch 1: origin kxk conv + BN
    y = _bn_ref(_conv_ref(x, params['origin_w'], pad=padding), params['origin_bn'])
    # branch 2: 1x1 conv + BN
    y = y + _bn_ref(_conv_ref(x, params['k1x1_w']), params['k1x1_bn'])
    # branch 3: 1x1 conv -> BN+pad -> AvgPool -> BN
    t = _bn_pad_ref(_conv_ref(x, params['avg_conv_w']), params['avg_bnpad'], padding)
    y = y + _bn_ref(_avgpool_ref(t, k), params['avg_bn'])
    # branch 4: IdentityBasedConv1x1 -> BN+pad -> kxk conv (pad 0) -> BN
    id_k = params['idconv_w'] + jnp.eye(cin, dtype=jnp.float32).reshape(cin, cin, 1, 1)
    u = _bn_pad_ref(_conv_ref(x, id_k), params['kxk_bn1'], padding)
    y = y + _bn_ref(_conv_ref(u, params['kxk_conv2_w']), params['kxk_bn2'])
    return y


# ---------------------------------------------------------------------------
if __name__ == "__main__":
    in_ch, out_ch, k, padding = 4, 8, 3, 1          # padding == kernel_size // 2
    key = jax.random.PRNGKey(0)
    kp_, kx_ = jax.random.split(key)
    params = init_dbb_params(kp_, in_ch, out_ch, k)
    x = jax.random.normal(kx_, (2, in_ch, 16, 16), jnp.float32)   # NCHW

    folded = fold_dbb_params(params, k)              # once, outside the jit path
    fwd = jax.jit(functools.partial(dbb_forward, k=k, padding=padding))
    out = jax.block_until_ready(fwd(x, folded))

    ref = dbb_forward_ref(x, params, k, padding)
    assert out.shape == (2, out_ch, 16, 16)
    # bf16 MXU operands vs f32 HIGHEST reference -> relaxed tolerance
    np.testing.assert_allclose(np.asarray(out), np.asarray(ref), rtol=2e-2, atol=3e-2)
    print("KERNEL_OK")
</pallas_src>

<mosaic_0001>
module attributes {stable_mosaic.version = 11 : i64} {
  func.func @_dbb_fused_kernel(%arg0: i32, %arg1: memref<48x512xbf16, #tpu.memory_space<vmem>>, %arg2: memref<8x48xbf16, #tpu.memory_space<vmem>>, %arg3: memref<8x1xf32, #tpu.memory_space<vmem>>, %arg4: memref<8x512xf32, #tpu.memory_space<vmem>>) attributes {dimension_semantics = [#tpu.dimension_semantics<parallel>], iteration_bounds = array<i64: 1>, scalar_prefetch = 0 : i64, scratch_operands = 0 : i64, tpu.core_type = #tpu.core_type<tc>, window_params = [{transform_indices = @transform_0, window_bounds = array<i64: 48, 512>}, {pipeline_mode = #tpu.pipeline_mode<synchronous>, transform_indices = @transform_1, window_bounds = array<i64: 8, 48>}, {pipeline_mode = #tpu.pipeline_mode<synchronous>, transform_indices = @transform_2, window_bounds = array<i64: 8, 1>}, {transform_indices = @transform_3, window_bounds = array<i64: 8, 512>}]} {
    %c0 = arith.constant 0 : index
    %c0_0 = arith.constant 0 : index
    %0 = vector.load %arg2[%c0, %c0_0] : memref<8x48xbf16, #tpu.memory_space<vmem>>, vector<8x48xbf16>
    %c0_1 = arith.constant 0 : index
    %c0_2 = arith.constant 0 : index
    %1 = vector.load %arg1[%c0_1, %c0_2] : memref<48x512xbf16, #tpu.memory_space<vmem>>, vector<48x512xbf16>
    %cst = arith.constant dense<0.000000e+00> : vector<8x512xf32>
    %2 = tpu.matmul %0, %1, %cst {dimension_numbers = #tpu.dot_dimension_numbers<[1], [0], [0], [1], [0, 0, 1, 1], [], []>} : vector<8x48xbf16>, vector<48x512xbf16>, vector<8x512xf32> -> vector<8x512xf32>
    %c0_3 = arith.constant 0 : index
    %c0_4 = arith.constant 0 : index
    %3 = vector.load %arg3[%c0_3, %c0_4] : memref<8x1xf32, #tpu.memory_space<vmem>>, vector<8x1xf32>
    %4 = vector.broadcast %3 : vector<8x1xf32> to vector<8x512xf32>
    %5 = arith.addf %2, %4 : vector<8x512xf32>
    %c0_5 = arith.constant 0 : index
    %c0_6 = arith.constant 0 : index
    %6 = vector.load %arg4[%c0_5, %c0_6] : memref<8x512xf32, #tpu.memory_space<vmem>>, vector<8x512xf32>
    tpu.vector_store %arg4[%c0_5, %c0_6], %5 {strides = array<i32>} : memref<8x512xf32, #tpu.memory_space<vmem>>, vector<8x512xf32>,
    return
  }
  func.func @transform_0(%arg0: i32) -> (i32, i32) {
    %c0_i32 = arith.constant 0 : i32
    %c0_i32_0 = arith.constant 0 : i32
    return %c0_i32, %arg0 : i32, i32
  }
  func.func @transform_1(%arg0: i32) -> (i32, i32) {
    %c0_i32 = arith.constant 0 : i32
    %c0_i32_0 = arith.constant 0 : i32
    %c0_i32_1 = arith.constant 0 : i32
    return %c0_i32, %c0_i32_0 : i32, i32
  }
  func.func @transform_2(%arg0: i32) -> (i32, i32) {
    %c0_i32 = arith.constant 0 : i32
    %c0_i32_0 = arith.constant 0 : i32
    %c0_i32_1 = arith.constant 0 : i32
    return %c0_i32, %c0_i32_0 : i32, i32
  }
  func.func @transform_3(%arg0: i32) -> (i32, i32) {
    %c0_i32 = arith.constant 0 : i32
    %c0_i32_0 = arith.constant 0 : i32
    return %c0_i32, %arg0 : i32, i32
  }
}

</mosaic_0001>

<bundles_post_ra>
// kernel: dbb_forward.1
= control target key start
LH: loop header
LB: loop body
LE: loop exit
PB: predicated region body
PF: predicated region fallthrough
CT: control target
= control target key end

     0   :  { %v224_v3 = vmov 0   ;;  %vm94_vm0 = vcmask 392192   ;;  %s335_s0 = inlined_call_operand.vmem [shape: bf16[48,512], index: 0, kind: input, shape index: {}]   ;;  %s336_s2 = inlined_call_operand.vmem [shape: f32[8,1], index: 2, kind: input, shape index: {}]   ;;  %s337_s1 = inlined_call_operand.vmem [shape: bf16[8,48], index: 1, kind: input, shape index: {}]   ;;  %s338_s3 = inlined_call_operand.vmem [shape: f32[8,512], index: 3, kind: output, shape index: {}]  }
   0x1   :  { %v192_v0 = vld [vmem:[%s335_s0 + $0x40] sm:$0xf]  ;;  %v220_v1 = vld [vmem:[%s335_s0 + $0x4c] sm:$0xf0]  ;;  %v218_v2 = vld [vmem:[%s335_s0 + $0x44] sm:$0xf]  ;;  %223 = vset.pattern.permute.xlu0 %v224_v3 }
   0x2   :  { %v193_v4 = vor.u32 %v220_v1, %v192_v0  ;;  %v194_v5 = vld [vmem:[%s335_s0 + $0x50] sm:$0xf0]  ;;  %v200_v6 = vld [vmem:[%s335_s0 + $0x48] sm:$0xf]  ;;  %v221_v7 = vld [vmem:[%s335_s0 + $0x54] sm:$0xf0] }
   0x3   :  { %v197_v8 = vor.u32 %v218_v2, %v194_v5  ;;  %v201_v9 = vor.u32 %v221_v7, %v200_v6  ;;  %v219_v10 = vld [vmem:[%s335_s0 + $0x4c] sm:$0xf]  ;;  %v202_v11 = vld [vmem:[%s335_s0 + $0x58] sm:$0xf0]  ;;  %v176_v12 = vld [vmem:[%s335_s0 + $0x20] sm:$0xf] }
   0x4   :  { %103 = vmatpush.bf16.msra.mxu0 %v193_v4  ;;  %v205_v13 = vor.u32 %v219_v10, %v202_v11  ;;  %v216_v14 = vld [vmem:[%s335_s0 + $0x2c] sm:$0xf0]  ;;  %v214_v15 = vld [vmem:[%s335_s0 + $0x24] sm:$0xf]  ;;  %v178_v16 = vld [vmem:[%s335_s0 + $0x30] sm:$0xf0] }
   0x5   :  { %116 = vmatpush.bf16.msra.mxu1 %v197_v8  ;;  %129 = vmatpush.bf16.msra.mxu2 %v201_v9  ;;  %v177_v17 = vor.u32 %v216_v14, %v176_v12  ;;  %v181_v18 = vor.u32 %v214_v15, %v178_v16  ;;  %v184_v19 = vld [vmem:[%s335_s0 + $0x28] sm:$0xf]  ;;  %v217_v20 = vld [vmem:[%s335_s0 + $0x34] sm:$0xf0]  ;;  %v215_v21 = vld [vmem:[%s335_s0 + $0x2c] sm:$0xf] }
   0x6   :  { %142 = vmatpush.bf16.msra.mxu3 %v205_v13  ;;  %v185_v22 = vor.u32 %v217_v20, %v184_v19  ;;  %v186_v23 = vld [vmem:[%s335_s0 + $0x38] sm:$0xf0]  ;;  %v160_v24 = vld [vmem:[%s335_s0] sm:$0xf]  ;;  %v212_v25 = vld [vmem:[%s335_s0 + $0xc] sm:$0xf0] }
   0x7   :  { %v189_v26 = vor.u32 %v215_v21, %v186_v23  ;;  %v210_v27 = vld [vmem:[%s335_s0 + $0x4] sm:$0xf]  ;;  %v162_v28 = vld [vmem:[%s335_s0 + $0x10] sm:$0xf0]  ;;  %v168_v29 = vld [vmem:[%s335_s0 + $0x8] sm:$0xf]  ;;  %v161_v30 = vor.u32 %v212_v25, %v160_v24 }
   0x8   :  { %104 = vmatpush.bf16.msra.mxu0 %v177_v17  ;;  %v213_v31 = vld [vmem:[%s335_s0 + $0x14] sm:$0xf0]  ;;  %v211_v32 = vld [vmem:[%s335_s0 + $0xc] sm:$0xf]  ;;  %v170_v33 = vld [vmem:[%s335_s0 + $0x18] sm:$0xf0]  ;;  %v165_v34 = vor.u32 %v210_v27, %v162_v28 }
   0x9   :  { %117 = vmatpush.bf16.msra.mxu1 %v181_v18  ;;  %130 = vmatpush.bf16.msra.mxu2 %v185_v22  ;;  %v169_v35 = vor.u32 %v213_v31, %v168_v29  ;;  %v28_v36 = vld [vmem:[%s336_s2] sm:$0xff]  ;;  %v173_v37 = vor.u32 %v211_v32, %v170_v33 }
   0xa   :  { %143 = vmatpush.bf16.msra.mxu3 %v189_v26  ;;  %31 = vperm.xlu0 %223, %v28_v36   ;;  %v15_v38 = vld [vmem:[%s337_s1] sm:$0xf] }
   0xc   :  { %105 = vmatpush.bf16.msra.mxu0 %v161_v30 }
   0xd   :  { %118 = vmatpush.bf16.msra.mxu1 %v165_v34  ;;  %131 = vmatpush.bf16.msra.mxu2 %v169_v35 }
   0xe   :  { %144 = vmatpush.bf16.msra.mxu3 %v173_v37 }
   0xf   :  { %206 = vmatmul.msk.bf16.vlgmr.msra.gmra.mxu0 %vm94_vm0, %v15_v38 }
  0x10   :  { %207 = vmatmul.msk.bf16.vlgmr.msra.gmra.mxu1 %vm94_vm0, %v15_v38  ;;  %208 = vmatmul.msk.bf16.vlgmr.msra.gmra.mxu2 %vm94_vm0, %v15_v38 }
  0x11   :  { %209 = vmatmul.msk.bf16.vlgmr.msra.gmra.mxu3 %vm94_vm0, %v15_v38 }
  0x7c   :  { %v32_v39 = vpop.permute.xlu0 %31 }
  0x8c   :  { %v107_v40 = vpop.f32.mrf.mxu0 }
  0x8d   :  { %v120_v41 = vpop.f32.mrf.mxu1  ;;  %v108_v42 = vadd.f32 %v107_v40, %v32_v39 }
  0x8e   :  { %v121_v43 = vadd.f32 %v120_v41, %v32_v39 }
  0x8f   :  { %150 = vst [vmem:[%s338_s3] sm:$0xff] %v108_v42 }
  0x90   :  { %151 = vst [vmem:[%s338_s3 + $0x8] sm:$0xff] %v121_v43 }
  0x93   :  { %v133_v44 = vpop.f32.mrf.mxu2 }
  0x94   :  { %v134_v45 = vadd.f32 %v133_v44, %v32_v39  ;;  %v146_v46 = vpop.f32.mrf.mxu3  ;;  %v109_v47 = vpop.f32.mrf.mxu0 }
  0x95   :  { %v147_v48 = vadd.f32 %v146_v46, %v32_v39  ;;  %v122_v49 = vpop.f32.mrf.mxu1 }
  0x96   :  { %152 = vst [vmem:[%s338_s3 + $0x10] sm:$0xff] %v134_v45 }
  0x97   :  { %153 = vst [vmem:[%s338_s3 + $0x18] sm:$0xff] %v147_v48 }
  0x9b   :  { %v135_v50 = vpop.f32.mrf.mxu2 }
  0x9c   :  { %v148_v51 = vpop.f32.mrf.mxu3 }

</bundles_post_ra>
